<compile_context>
chip_gen: v5e
topology: v5e:2x2
jax: 0.10.0
libtpu: 0.0.40
codegen_flags: <defaults>
</compile_context>

<pallas_src>
import numpy as np
import jax
import jax.numpy as jnp
from jax.experimental import pallas as pl
from jax.experimental.pallas import tpu as pltpu

BN_EPS = 1e-5          # torch.nn.BatchNorm1d default
LANE = 128             # TPU lane width
SUBLANE = 8            # f32 sublane width
MIN_GRID_STEPS = 2     # v7x megacore: >= 2 "parallel" steps so both TCs work


def _round_up(n, m):
    return ((n + m - 1) // m) * m


def _cdiv(a, b):
    return -(-a // b)


# ---------------------------------------------------------------------------
# Kernel: fused (BN-folded Linear -> ReLU) x num_layers on one batch tile.
# ---------------------------------------------------------------------------
def make_fused_head_kernel(num_layers, compute_dtype, precision=None):
    def kernel(*refs):
        # refs = (x, w0, b0, w1, b1, ..., out)
        x_ref, o_ref = refs[0], refs[-1]
        s = x_ref[...].astype(compute_dtype)              # cast in vregs (free-ish)
        for i in range(num_layers):
            w = refs[1 + 2 * i][...]                      # (F_in_pad, F_out_pad)
            b = refs[2 + 2 * i][...]                      # (1, F_out_pad) f32
            y = jnp.dot(s, w, preferred_element_type=jnp.float32,
                        precision=precision)
            y = jnp.maximum(y + b, 0.0)                   # epilogue in f32
            s = y if i == num_layers - 1 else y.astype(compute_dtype)
        o_ref[...] = s.astype(o_ref.dtype)
    return kernel


# ---------------------------------------------------------------------------
# Parameters
# ---------------------------------------------------------------------------
def init_head_params(key, input_num, dense_layers):
    """Deterministic synthetic params (shapes match nn.Linear / nn.BatchNorm1d)."""
    params = []
    for i, out_f in enumerate(dense_layers):
        in_f = input_num if i == 0 else dense_layers[i - 1]
        key, k1, k2, k3, k4, k5, k6 = jax.random.split(key, 7)
        bound = 1.0 / np.sqrt(in_f)
        params.append(dict(
            w=jax.random.uniform(k1, (out_f, in_f), jnp.float32, -bound, bound),
            b=jax.random.uniform(k2, (out_f,), jnp.float32, -bound, bound),
            gamma=jax.random.uniform(k3, (out_f,), jnp.float32, 0.5, 1.5),
            beta=jax.random.uniform(k4, (out_f,), jnp.float32, -0.5, 0.5),
            mean=0.1 * jax.random.normal(k5, (out_f,), jnp.float32),
            var=jax.random.uniform(k6, (out_f,), jnp.float32, 0.5, 1.5),
        ))
    return params


def prepare_head_params(params, compute_dtype=jnp.bfloat16):
    """One-time prep: fold eval-mode BN into each Linear, transpose to
    (F_in, F_out), and zero-pad to lane-dense (multiple-of-128) widths.

    compute_dtype=bfloat16 (default) is the throughput configuration; pass
    float32 only for exact-numerics checks."""
    prepared = []
    for p in params:
        out_f, in_f = p["w"].shape
        scale = p["gamma"] / jnp.sqrt(p["var"] + BN_EPS)          # (F_out,)
        w_fused = (p["w"] * scale[:, None]).T                     # (F_in, F_out)
        b_fused = (p["b"] - p["mean"]) * scale + p["beta"]        # (F_out,)
        in_pad, out_pad = _round_up(in_f, LANE), _round_up(out_f, LANE)
        w_p = jnp.zeros((in_pad, out_pad), jnp.float32).at[:in_f, :out_f].set(w_fused)
        b_p = jnp.zeros((1, out_pad), jnp.float32).at[:, :out_f].set(b_fused)
        prepared.append(dict(w=w_p.astype(compute_dtype),
                             b=b_p,                # epilogue stays f32
                             out_features=out_f))
    return prepared


# ---------------------------------------------------------------------------
# Forward
# ---------------------------------------------------------------------------
def head_forward(x, prepared, *, tile_b=2048, precision=None,
                 out_dtype=jnp.float32, out_padded=False):
    """Head.forward: Flatten, then the fused (Linear+BN folded)->ReLU stack.

    x: (B, C, D, H, W), any float dtype (cast to the weight dtype in-kernel).
    Returns (B, dense_layers[-1]) by default; with out_padded=True returns the
    lane-dense (B_pad, F_out_pad) slab so the consumer can skip the slice."""
    B = x.shape[0]
    compute_dtype = prepared[0]["w"].dtype        # knob lives in prepare_*()
    num_layers = len(prepared)
    F_in_pad = prepared[0]["w"].shape[0]
    F_out = prepared[-1]["out_features"]
    F_out_pad = prepared[-1]["b"].shape[1]

    s = x.reshape(B, -1)                          # nn.Flatten(): free reshape
    F_in = s.shape[1]

    kernel = make_fused_head_kernel(num_layers, compute_dtype, precision)
    weight_operands = []
    for p in prepared:
        weight_operands += [p["w"], p["b"]]
    weight_bytes = sum(int(np.prod(a.shape)) * a.dtype.itemsize
                       for a in weight_operands)
    layer_flops = sum(int(p["w"].shape[0]) * int(p["w"].shape[1])
                      for p in prepared)
    out_itemsize = np.dtype(out_dtype).itemsize

    if B <= SUBLANE:
        # --- Tiny-batch latency path: one whole-array VMEM call, no grid. ---
        B_pad = SUBLANE
        if B_pad != B or F_in != F_in_pad:
            # single fused pad (keeps the input's native dtype; cast in-kernel)
            s = jnp.zeros((B_pad, F_in_pad), s.dtype).at[:B, :F_in].set(s)
        cost = pl.CostEstimate(
            flops=2 * B_pad * layer_flops, transcendentals=0,
            bytes_accessed=(int(s.size) * s.dtype.itemsize
                            + B_pad * F_out_pad * out_itemsize + weight_bytes))
        vmem = pl.BlockSpec(memory_space=pltpu.MemorySpace.VMEM)
        out = pl.pallas_call(
            kernel,
            out_shape=jax.ShapeDtypeStruct((B_pad, F_out_pad), out_dtype),
            in_specs=[vmem] * (1 + len(weight_operands)),
            out_specs=vmem,
            cost_estimate=cost,
        )(s, *weight_operands)
    else:
        # --- Batch-tiled "parallel" grid (>=2 steps -> both v7x TCs). -------
        steps = max(MIN_GRID_STEPS, _cdiv(B, max(SUBLANE, tile_b)))
        tile = _round_up(_cdiv(B, steps), SUBLANE)   # balanced -> minimal pad
        grid = _cdiv(B, tile)
        B_pad = grid * tile
        if B_pad != B or F_in != F_in_pad:
            # single fused pad; skipped entirely when B % tile == 0
            s = jnp.zeros((B_pad, F_in_pad), s.dtype).at[:B, :F_in].set(s)

        in_specs = [pl.BlockSpec((tile, F_in_pad), lambda i: (i, 0))]
        for p in prepared:
            # Constant block index -> weights stay resident across grid steps.
            # NOTE: pipeline_mode=pl.Buffered(1) on these would also drop the
            # unused second buffer (~200 KiB); omitted for version portability.
            in_specs.append(pl.BlockSpec(p["w"].shape, lambda i: (0, 0)))
            in_specs.append(pl.BlockSpec(p["b"].shape, lambda i: (0, 0)))

        cost = pl.CostEstimate(
            flops=2 * B_pad * layer_flops, transcendentals=0,
            bytes_accessed=(B_pad * F_in_pad * s.dtype.itemsize
                            + B_pad * F_out_pad * out_itemsize + weight_bytes))
        out = pl.pallas_call(
            kernel,
            out_shape=jax.ShapeDtypeStruct((B_pad, F_out_pad), out_dtype),
            grid=(grid,),
            in_specs=in_specs,
            out_specs=pl.BlockSpec((tile, F_out_pad), lambda i: (i, 0)),
            compiler_params=pltpu.CompilerParams(
                dimension_semantics=("parallel",)),
            cost_estimate=cost,
        )(s, *weight_operands)

    if out_padded:
        return out                     # lane-dense slab, no slice round-trip
    return out[:B, :F_out]
    # TODO(synk): args.dropout > 0.0 (training-mode nn.Dropout) is stochastic;
    # with dropout=0.0 in this config no Dropout layers exist, so nothing is lost.


def head_forward_ref(x, params):
    """Pure-JAX reference of the original (unfolded) forward pass."""
    B = x.shape[0]
    s = x.reshape(B, -1).astype(jnp.float32)
    for p in params:
        s = jnp.dot(s, p["w"].T, precision=jax.lax.Precision.HIGHEST) + p["b"]
        s = (s - p["mean"]) / jnp.sqrt(p["var"] + BN_EPS) * p["gamma"] + p["beta"]
        s = jnp.maximum(s, 0.0)
    return s


if __name__ == "__main__":
    # Small, module-consistent shapes: batch=2, num_channels=4, board (4,4,4).
    B = 2
    num_channels = 4
    board_size = (4, 4, 4)
    dense_layers = [32, 32]
    input_num = num_channels * int(np.prod(board_size))   # 256

    key = jax.random.PRNGKey(0)
    key, xk, x2k, pk = jax.random.split(key, 4)
    x = jax.random.normal(xk, (B, num_channels) + board_size, jnp.float32)

    params = init_head_params(pk, input_num, dense_layers)

    # 1) Exact-numerics check (f32 weights + HIGHEST precision), tiny-batch path.
    prepared_f32 = prepare_head_params(params, compute_dtype=jnp.float32)
    fwd_exact = jax.jit(lambda inp: head_forward(
        inp, prepared_f32, precision=jax.lax.Precision.HIGHEST))
    out = jax.block_until_ready(fwd_exact(x))
    ref = jax.block_until_ready(head_forward_ref(x, params))
    assert out.shape == (B, dense_layers[-1])
    np.testing.assert_allclose(np.asarray(out), np.asarray(ref),
                               rtol=1e-5, atol=1e-5)

    # 2) Batch-tiled "parallel" grid path (multi-step), still exact.
    B2 = 20
    x2 = jax.random.normal(x2k, (B2, num_channels) + board_size, jnp.float32)
    out2 = jax.block_until_ready(head_forward(
        x2, prepared_f32, tile_b=8, precision=jax.lax.Precision.HIGHEST))
    ref2 = jax.block_until_ready(head_forward_ref(x2, params))
    np.testing.assert_allclose(np.asarray(out2), np.asarray(ref2),
                               rtol=1e-5, atol=1e-5)

    # 3) Throughput configuration: bf16 weights + bf16 activations (defaults),
    #    default large tile; loose tolerance (precision knob, not a bug).
    prepared_bf16 = prepare_head_params(params)            # bf16 by default
    out3 = jax.block_until_ready(head_forward(
        x2.astype(jnp.bfloat16), prepared_bf16))
    np.testing.assert_allclose(np.asarray(out3), np.asarray(ref2),
                               rtol=1e-1, atol=1e-1)

    print("KERNEL_OK")
</pallas_src>

<mosaic_0001>
module attributes {stable_mosaic.version = 11 : i64} {
  func.func @kernel(%arg0: memref<8x256xf32, #tpu.memory_space<vmem>>, %arg1: memref<256x128xf32, #tpu.memory_space<vmem>>, %arg2: memref<1x128xf32, #tpu.memory_space<vmem>>, %arg3: memref<128x128xf32, #tpu.memory_space<vmem>>, %arg4: memref<1x128xf32, #tpu.memory_space<vmem>>, %arg5: memref<8x128xf32, #tpu.memory_space<vmem>>) attributes {dimension_semantics = [], scalar_prefetch = 0 : i64, scratch_operands = 0 : i64, tpu.core_type = #tpu.core_type<tc>} {
    %c0 = arith.constant 0 : index
    %c0_0 = arith.constant 0 : index
    %0 = vector.load %arg0[%c0, %c0_0] : memref<8x256xf32, #tpu.memory_space<vmem>>, vector<8x256xf32>
    %c0_1 = arith.constant 0 : index
    %c0_2 = arith.constant 0 : index
    %1 = vector.load %arg1[%c0_1, %c0_2] : memref<256x128xf32, #tpu.memory_space<vmem>>, vector<256x128xf32>
    %c0_3 = arith.constant 0 : index
    %c0_4 = arith.constant 0 : index
    %2 = vector.load %arg2[%c0_3, %c0_4] : memref<1x128xf32, #tpu.memory_space<vmem>>, vector<1x128xf32>
    %cst = arith.constant dense<0.000000e+00> : vector<8x128xf32>
    %3 = tpu.matmul %0, %1, %cst {dimension_numbers = #tpu.dot_dimension_numbers<[1], [0], [0], [1], [0, 0, 1, 1], [], []>, precision = #tpu.contract_precision<fp32>} : vector<8x256xf32>, vector<256x128xf32>, vector<8x128xf32> -> vector<8x128xf32>
    %4 = vector.broadcast %2 : vector<1x128xf32> to vector<8x128xf32>
    %5 = arith.addf %3, %4 : vector<8x128xf32>
    %cst_5 = arith.constant 0.000000e+00 : f32
    %6 = vector.broadcast %cst_5 : f32 to vector<8x128xf32>
    %7 = arith.maximumf %5, %6 : vector<8x128xf32>
    %c0_6 = arith.constant 0 : index
    %c0_7 = arith.constant 0 : index
    %8 = vector.load %arg3[%c0_6, %c0_7] : memref<128x128xf32, #tpu.memory_space<vmem>>, vector<128x128xf32>
    %c0_8 = arith.constant 0 : index
    %c0_9 = arith.constant 0 : index
    %9 = vector.load %arg4[%c0_8, %c0_9] : memref<1x128xf32, #tpu.memory_space<vmem>>, vector<1x128xf32>
    %cst_10 = arith.constant dense<0.000000e+00> : vector<8x128xf32>
    %10 = tpu.matmul %7, %8, %cst_10 {dimension_numbers = #tpu.dot_dimension_numbers<[1], [0], [0], [1], [0, 0, 1, 1], [], []>, precision = #tpu.contract_precision<fp32>} : vector<8x128xf32>, vector<128x128xf32>, vector<8x128xf32> -> vector<8x128xf32>
    %11 = vector.broadcast %9 : vector<1x128xf32> to vector<8x128xf32>
    %12 = arith.addf %10, %11 : vector<8x128xf32>
    %cst_11 = arith.constant 0.000000e+00 : f32
    %13 = vector.broadcast %cst_11 : f32 to vector<8x128xf32>
    %14 = arith.maximumf %12, %13 : vector<8x128xf32>
    %c0_12 = arith.constant 0 : index
    %c0_13 = arith.constant 0 : index
    %15 = vector.load %arg5[%c0_12, %c0_13] : memref<8x128xf32, #tpu.memory_space<vmem>>, vector<8x128xf32>
    tpu.vector_store %arg5[%c0_12, %c0_13], %14 {strides = array<i32>} : memref<8x128xf32, #tpu.memory_space<vmem>>, vector<8x128xf32>,
    return
  }
}

</mosaic_0001>

<bundles_post_ra>
// kernel: _lambda_.1
= control target key start
LH: loop header
LB: loop body
LE: loop exit
PB: predicated region body
PF: predicated region fallthrough
CT: control target
= control target key end

     0   :  { %10 = vsyncpa [#allocation3], 0  ;;  %s1156_s21 = smov [#allocation2]   ;;  %s1157_s23 = smov 128   ;;  %s1979_s0 = inlined_call_operand.vmem [shape: f32[8,256], index: 0, kind: input, shape index: {}]   ;;  %s1980_s1 = inlined_call_operand.hbm [shape: f32[256,128], index: 1, kind: input, shape index: {}]   ;;  %s1981_s2 = inlined_call_operand.vmem [shape: f32[1,128], index: 2, kind: input, shape index: {}]   ;;  %s1982_s3 = inlined_call_operand.vmem [shape: f32[128,128], index: 3, kind: input, shape index: {}]   ;;  %s1983_s4 = inlined_call_operand.vmem [shape: f32[1,128], index: 4, kind: input, shape index: {}]   ;;  %s1984_s5 = inlined_call_operand.vmem [shape: f32[8,128], index: 5, kind: output, shape index: {}]  }
   0x1   :  { %s17_s20 = sshll.u32 %s1980_s1, 4  ;;  %s19_s22 = sshll.u32 %s1156_s21, 4  ;;  %s18_s20 = int_to_ptr.hbm [resolvable:$true] %s17_s20  ;;  %s20_s22 = int_to_ptr.vmem [resolvable:$true] %s19_s22 }
   0x2   :  { %s1158_s24 = smov 8  }
   0x3   :  { %25 = dma.hbm_to_vmem [thread:$0]  %s18_s20, 4096, %s20_s22, [#allocation3], %s1157_s23, %s1157_s23, %s1158_s24  }
   0x4   :  { %1154 = dma.done.wait [#allocation3], 4096  }
   0x5   :  { %1155 = vsyncadd [#allocation3], 4294963200  ;;  %v53_v0 = vld [vmem:[#allocation2 + $0x78] sm:$0xff]  ;;  %v52_v1 = vld [vmem:[#allocation2 + $0x70] sm:$0xff] }
   0x6   :  { %v51_v2 = vld [vmem:[#allocation2 + $0x68] sm:$0xff]  ;;  %v1192_v3 = vand.u32 4294901760, %v53_v0  ;;  %v1194_v4 = vand.u32 4294901760, %v52_v1  ;;  %v50_v6 = vld [vmem:[#allocation2 + $0x60] sm:$0xff]  ;;  %v49_v7 = vld [vmem:[#allocation2 + $0x58] sm:$0xff] }
   0x7   :  { %v1196_v5 = vand.u32 4294901760, %v51_v2  ;;  %v48_v8 = vld [vmem:[#allocation2 + $0x50] sm:$0xff]  ;;  %v1198_v9 = vand.u32 4294901760, %v50_v6  ;;  %v1200_v10 = vand.u32 4294901760, %v49_v7  ;;  %v47_v12 = vld [vmem:[#allocation2 + $0x48] sm:$0xff]  ;;  %v46_v13 = vld [vmem:[#allocation2 + $0x40] sm:$0xff] }
   0x8   :  { %v1202_v11 = vand.u32 4294901760, %v48_v8  ;;  %75 = vmatpush.msra.mxu0 %v1192_v3  ;;  %v1206_v14 = vsub.f32 %v53_v0, %v1192_v3  ;;  %v1209_v15 = vsub.f32 %v52_v1, %v1194_v4  ;;  %271 = vmatpush.msra.mxu3 %v1192_v3  ;;  %v1215_v17 = vand.u32 4294901760, %v47_v12  ;;  %v45_v21 = vld [vmem:[#allocation2 + $0x38] sm:$0xff]  ;;  %v44_v26 = vld [vmem:[#allocation2 + $0x30] sm:$0xff]  ;;  %v43_v36 = vld [vmem:[#allocation2 + $0x28] sm:$0xff] }
   0x9   :  { %v1213_v16 = vsub.f32 %v51_v2, %v1196_v5  ;;  %v1218_v18 = vsub.f32 %v50_v6, %v1198_v9  ;;  %v1221_v19 = vsub.f32 %v49_v7, %v1200_v10  ;;  %v1231_v25 = vand.u32 4294901760, %v46_v13  ;;  %v42_v42 = vld [vmem:[#allocation2 + $0x20] sm:$0xff]  ;;  %v41_v47 = vld [vmem:[#allocation2 + $0x18] sm:$0xff]  ;;  %v40_v54 = vld [vmem:[#allocation2 + $0x10] sm:$0xff] }
   0xa   :  { %v1224_v20 = vsub.f32 %v48_v8, %v1202_v11  ;;  %77 = vmatpush.msra.mxu0 %v1194_v4  ;;  %218 = vmatpush.msra.mxu2 %v1206_v14  ;;  %v117_v22 = vand.u32 4294901760, %v1206_v14  ;;  %v2000_v23 = vand.u32 4294901760, %v1209_v15  ;;  %v1237_v29 = vsub.f32 %v47_v12, %v1215_v17  ;;  %v69_v59 = vld [vmem:[#allocation2 + $0xf8] sm:$0xff]  ;;  %v39_v61 = vld [vmem:[#allocation2 + $0x8] sm:$0xff]  ;;  %v38_v2 = vld [vmem:[#allocation2] sm:$0xff] }
   0xb   :  { %v1998_v24 = vand.u32 4294901760, %v1213_v16  ;;  %273 = vmatpush.msra.mxu3 %v1194_v4  ;;  %v1997_v27 = vand.u32 4294901760, %v1218_v18  ;;  %v1994_v28 = vand.u32 4294901760, %v1221_v19  ;;  %v1250_v33 = vand.u32 4294901760, %v45_v21  ;;  %v68_v6 = vld [vmem:[#allocation2 + $0xf0] sm:$0xff] }
   0xc   :  { %79 = vmatpush.msra.mxu0 %v1196_v5  ;;  %221 = vmatpush.msra.mxu2 %v1209_v15  ;;  %v118_v30 = vsub.f32 %v1206_v14, %v117_v22  ;;  %v124_v31 = vsub.f32 %v1209_v15, %v2000_v23  ;;  %v1253_v34 = vand.u32 4294901760, %v44_v26  ;;  %v1992_v35 = vand.u32 4294901760, %v1224_v20 }
   0xd   :  { %v130_v32 = vsub.f32 %v1213_v16, %v1998_v24  ;;  %275 = vmatpush.msra.mxu3 %v1196_v5  ;;  %v136_v39 = vsub.f32 %v1218_v18, %v1997_v27  ;;  %v1262_v40 = vsub.f32 %v46_v13, %v1231_v25  ;;  %v142_v41 = vsub.f32 %v1221_v19, %v1994_v28 }
   0xe   :  { %81 = vmatpush.msra.mxu0 %v1198_v9  ;;  %v119_v37 = vand.u32 4294901760, %v118_v30  ;;  %224 = vmatpush.msra.mxu2 %v1213_v16  ;;  %v125_v38 = vand.u32 4294901760, %v124_v31  ;;  %v1269_v44 = vand.u32 4294901760, %v43_v36  ;;  %v1991_v45 = vand.u32 4294901760, %v1237_v29 }
   0xf   :  { %277 = vmatpush.msra.mxu3 %v1198_v9  ;;  %v131_v43 = vand.u32 4294901760, %v130_v32  ;;  %v1273_v46 = vsub.f32 %v45_v21, %v1250_v33  ;;  %v148_v48 = vsub.f32 %v1224_v20, %v1992_v35  ;;  %v137_v49 = vand.u32 4294901760, %v136_v39  ;;  %v67_v32 = vld [vmem:[#allocation2 + $0xe8] sm:$0xff] }
  0x10   :  { %83 = vmatpush.msra.mxu0 %v1200_v10  ;;  %120 = vmatpush.msra.mxu1 %v119_v37  ;;  %v1281_v50 = vand.u32 4294901760, %v42_v42  ;;  %v1990_v51 = vand.u32 4294901760, %v1262_v40  ;;  %v1285_v52 = vsub.f32 %v44_v26, %v1253_v34  ;;  %v1289_v53 = vand.u32 4294901760, %v41_v47 }
  0x11   :  { %227 = vmatpush.msra.mxu2 %v1218_v18  ;;  %279 = vmatpush.msra.mxu3 %v1200_v10  ;;  %v143_v55 = vand.u32 4294901760, %v142_v41  ;;  %v154_v56 = vsub.f32 %v1237_v29, %v1991_v45  ;;  %v1989_v57 = vand.u32 4294901760, %v1273_v46  ;;  %v1297_v58 = vsub.f32 %v43_v36, %v1269_v44  ;;  %v62_v45 = vld [vmem:[#allocation2 + $0xc0] sm:$0xff] }
  0x12   :  { %85 = vmatpush.msra.mxu0 %v1202_v11  ;;  %126 = vmatpush.msra.mxu1 %v125_v38  ;;  %v149_v60 = vand.u32 4294901760, %v148_v48  ;;  %v160_v62 = vsub.f32 %v1262_v40, %v1990_v51  ;;  %v1305_v63 = vand.u32 4294901760, %v40_v54  ;;  %v1988_v0 = vand.u32 4294901760, %v1285_v52 }
  0x13   :  { %230 = vmatpush.msra.mxu2 %v1221_v19  ;;  %281 = vmatpush.msra.mxu3 %v1202_v11  ;;  %v1309_v1 = vsub.f32 %v42_v42, %v1281_v50  ;;  %v1314_v7 = vsub.f32 %v41_v47, %v1289_v53  ;;  %v1316_v8 = vand.u32 4294901760, %v69_v59  ;;  %v155_v12 = vand.u32 4294901760, %v154_v56 }
  0x14   :  { %87 = vmatpush.msra.mxu0 %v1215_v17  ;;  %132 = vmatpush.msra.mxu1 %v131_v43  ;;  %v166_v13 = vsub.f32 %v1273_v46, %v1989_v57  ;;  %v1322_v21 = vand.u32 4294901760, %v39_v61  ;;  %v1986_v26 = vand.u32 4294901760, %v1297_v58  ;;  %v1327_v30 = vand.u32 4294901760, %v38_v2  ;;  %v66_v43 = vld [vmem:[#allocation2 + $0xe0] sm:$0xff]  ;;  %v63_v57 = vld [vmem:[#allocation2 + $0xc8] sm:$0xff] }
  0x15   :  { %233 = vmatpush.msra.mxu2 %v1224_v20  ;;  %283 = vmatpush.msra.mxu3 %v1215_v17  ;;  %v1329_v31 = vand.u32 4294901760, %v68_v6  ;;  %v161_v36 = vand.u32 4294901760, %v160_v62  ;;  %v172_v37 = vsub.f32 %v1285_v52, %v1988_v0  ;;  %v1985_v38 = vand.u32 4294901760, %v1309_v1 }
  0x16   :  { %89 = vmatpush.msra.mxu0 %v1231_v25  ;;  %138 = vmatpush.msra.mxu1 %v137_v49  ;;  %2004 = vst [vmem:[#allocation5_spill] sm:$0xff] %v1327_v30  ;;  %v1337_v39 = vsub.f32 %v40_v54, %v1305_v63  ;;  %v1987_v41 = vand.u32 4294901760, %v1314_v7  ;;  %v1343_v42 = vsub.f32 %v69_v59, %v1316_v8  ;;  %v167_v47 = vand.u32 4294901760, %v166_v13  ;;  %v65_v59 = vld [vmem:[#allocation2 + $0xd8] sm:$0xff]  ;;  %v64_v13 = vld [vmem:[#allocation2 + $0xd0] sm:$0xff] }
  0x17   :  { %236 = vmatpush.msra.mxu2 %v1237_v29  ;;  %285 = vmatpush.msra.mxu3 %v1231_v25  ;;  %v178_v48 = vsub.f32 %v1297_v58, %v1986_v26  ;;  %v1350_v49 = vsub.f32 %v39_v61, %v1322_v21  ;;  %v1352_v54 = vand.u32 4294901760, %v67_v32  ;;  %v1360_v56 = vsub.f32 %v68_v6, %v1329_v31 }
  0x18   :  { %91 = vmatpush.msra.mxu0 %v1250_v33  ;;  %144 = vmatpush.msra.mxu1 %v143_v55  ;;  %v1357_v55 = vsub.f32 %v38_v2, %v1327_v30  ;;  %v184_v61 = vsub.f32 %v1309_v1, %v1985_v38  ;;  %v1993_v62 = vand.u32 4294901760, %v1337_v39  ;;  %v190_v2 = vsub.f32 %v1314_v7, %v1987_v41 }
  0x19   :  { %239 = vmatpush.msra.mxu2 %v1262_v40  ;;  %287 = vmatpush.msra.mxu3 %v1250_v33  ;;  %v1995_v6 = vand.u32 4294901760, %v1343_v42  ;;  %v1378_v38 = vsub.f32 %v67_v32, %v1352_v54  ;;  %v1380_v26 = vand.u32 4294901760, %v65_v59  ;;  %v1999_v0 = vand.u32 4294901760, %v1360_v56 }
  0x1a   :  { %93 = vmatpush.msra.mxu0 %v1253_v34  ;;  %150 = vmatpush.msra.mxu1 %v149_v60  ;;  %v173_v60 = vand.u32 4294901760, %v172_v37  ;;  %v1996_v37 = vand.u32 4294901760, %v1350_v49  ;;  %v2001_v41 = vand.u32 4294901760, %v1357_v55  ;;  %v196_v32 = vsub.f32 %v1337_v39, %v1993_v62 }
  0x1b   :  { %242 = vmatpush.msra.mxu2 %v1273_v46  ;;  %289 = vmatpush.msra.mxu3 %v1253_v34  ;;  %v1393_v51 = vand.u32 4294901760, %v64_v13  ;;  %v191_v35 = vand.u32 4294901760, %v190_v2  ;;  %v1406_v62 = vsub.f32 %v65_v59, %v1380_v26  ;;  %v1408_v28 = vand.u32 4294901760, %v63_v57  ;;  %v61_v2 = vld [vmem:[#allocation2 + $0xb8] sm:$0xff] }
  0x1c   :  { %95 = vmatpush.msra.mxu0 %v1269_v44  ;;  %156 = vmatpush.msra.mxu1 %v155_v12  ;;  %v1367_v12 = vand.u32 4294901760, %v66_v43  ;;  %v208_v59 = vsub.f32 %v1357_v55, %v2001_v41  ;;  %v1428_v23 = vand.u32 4294901760, %v61_v2  ;;  %v2006_v14 = vand.u32 4294901760, %v1209_v15 }
  0x1d   :  { %245 = vmatpush.msra.mxu2 %v1285_v52  ;;  %291 = vmatpush.msra.mxu3 %v1269_v44  ;;  %v1423_v24 = vsub.f32 %v64_v13, %v1393_v51  ;;  %v1436_v27 = vsub.f32 %v63_v57, %v1408_v28  ;;  %v2008_v15 = vand.u32 4294901760, %v1213_v16  ;;  %v2010_v16 = vand.u32 4294901760, %v1218_v18 }
  0x1e   :  { %97 = vmatpush.msra.mxu0 %v1281_v50  ;;  %162 = vmatpush.msra.mxu1 %v161_v36  ;;  %v179_v36 = vand.u32 4294901760, %v178_v48  ;;  %v1391_v48 = vsub.f32 %v66_v43, %v1367_v12  ;;  %v202_v43 = vsub.f32 %v1350_v49, %v1996_v37  ;;  %v197_v37 = vand.u32 4294901760, %v196_v32 }
  0x1f   :  { %248 = vmatpush.msra.mxu2 %v1297_v58  ;;  %293 = vmatpush.msra.mxu3 %v1281_v50  ;;  %v2005_v32 = vand.u32 4294901760, %v1378_v38  ;;  %v2012_v18 = vand.u32 4294901760, %v1221_v19 }
  0x20   :  { %99 = vmatpush.msra.mxu0 %v1289_v53  ;;  %168 = vmatpush.msra.mxu1 %v167_v47  ;;  %v185_v47 = vand.u32 4294901760, %v184_v61  ;;  %v60_v61 = vld [vmem:[#allocation2 + $0xb0] sm:$0xff] }
  0x21   :  { %251 = vmatpush.msra.mxu2 %v1309_v1  ;;  %295 = vmatpush.msra.mxu3 %v1289_v53  ;;  %v471_v41 = vsub.f32 %v1378_v38, %v2005_v32  ;;  %v2007_v32 = vand.u32 4294901760, %v1391_v48 }
  0x22   :  { %101 = vmatpush.msra.mxu0 %v1305_v63  ;;  %174 = vmatpush.msra.mxu1 %v173_v60  ;;  %v459_v60 = vsub.f32 %v1343_v42, %v1995_v6  ;;  %v1415_v6 = vand.u32 4294901760, %v62_v45 }
  0x23   :  { %254 = vmatpush.msra.mxu2 %v1314_v7  ;;  %297 = vmatpush.msra.mxu3 %v1305_v63  ;;  %v477_v13 = vsub.f32 %v1391_v48, %v2007_v32 }
  0x24   :  { %103 = vmatpush.msra.mxu0 %v1322_v21  ;;  %180 = vmatpush.msra.mxu1 %v179_v36  ;;  %v465_v36 = vsub.f32 %v1360_v56, %v1999_v0  ;;  %v460_v0 = vand.u32 4294901760, %v459_v60  ;;  %v59_v60 = vld [vmem:[#allocation2 + $0xa8] sm:$0xff] }
  0x25   :  { %257 = vmatpush.msra.mxu2 %v1337_v39  ;;  %299 = vmatpush.msra.mxu3 %v1322_v21  ;;  %v1461_v57 = vand.u32 4294901760, %v59_v60 }
  0x26   :  { %105 = vmatpush.msra.mxu0 %v1327_v30  ;;  %186 = vmatpush.msra.mxu1 %v185_v47  ;;  %v203_v47 = vand.u32 4294901760, %v202_v43  ;;  %v209_v43 = vand.u32 4294901760, %v208_v59  ;;  %v2009_v59 = vand.u32 4294901760, %v1406_v62 }
  0x27   :  { %260 = vmatpush.msra.mxu2 %v1350_v49  ;;  %301 = vmatpush.msra.mxu3 %v1327_v30  ;;  %v1449_v30 = vand.u32 4294901760, %v60_v61 }
  0x28   :  { %312 = vmatpush.msrb.mxu0 %v117_v22  ;;  %192 = vmatpush.msra.mxu1 %v191_v35  ;;  %v466_v22 = vand.u32 4294901760, %v465_v36  ;;  %v1442_v35 = vsub.f32 %v62_v45, %v1415_v6  ;;  %v1454_v45 = vsub.f32 %v61_v2, %v1428_v23  ;;  %v58_v36 = vld [vmem:[#allocation2 + $0xa0] sm:$0xff]  ;;  %v57_v2 = vld [vmem:[#allocation2 + $0x98] sm:$0xff] }
  0x29   :  { %263 = vmatpush.msra.mxu2 %v1357_v55  ;;  %461 = vmatpush.msrb.mxu3 %v460_v0  ;;  %v1473_v32 = vand.u32 4294901760, %v58_v36  ;;  %v1489_v19 = vand.u32 4294901760, %v57_v2 }
  0x2a   :  { %316 = vmatpush.msrb.mxu0 %v2006_v14  ;;  %198 = vmatpush.msra.mxu1 %v197_v37  ;;  %v472_v37 = vand.u32 4294901760, %v471_v41  ;;  %v483_v14 = vsub.f32 %v1406_v62, %v2009_v59  ;;  %v2003_v0 = vand.u32 4294901760, %v1442_v35  ;;  %v2011_v41 = vand.u32 4294901760, %v1423_v24 }
  0x2b   :  { %416 = vmatpush.msrb.mxu2 %v1316_v8  ;;  %467 = vmatpush.msrb.mxu3 %v466_v22  ;;  %v1471_v59 = vsub.f32 %v60_v61, %v1449_v30  ;;  %v2013_v61 = vand.u32 4294901760, %v1436_v27 }
  0x2c   :  { %320 = vmatpush.msrb.mxu0 %v2008_v15  ;;  %204 = vmatpush.msra.mxu1 %v203_v47  ;;  %v478_v47 = vand.u32 4294901760, %v477_v13  ;;  %v489_v15 = vsub.f32 %v1423_v24, %v2011_v41  ;;  %v36_v13 = vld [vmem:[%s1979_s0] sm:$0xff]  ;;  %v1487_v41 = vsub.f32 %v59_v60, %v1461_v57  ;;  %v1500_v60 = vsub.f32 %v58_v36, %v1473_v32 }
  0x2d   :  { %418 = vmatpush.msrb.mxu2 %v1329_v31  ;;  %473 = vmatpush.msrb.mxu3 %v472_v37  ;;  %v56_v37 = vld [vmem:[#allocation2 + $0x90] sm:$0xff]  ;;  %v1502_v22 = vand.u32 4294901760, %v36_v13 }
  0x2e   :  { %324 = vmatpush.msrb.mxu0 %v2010_v16  ;;  %210 = vmatpush.msra.mxu1 %v209_v43  ;;  %v484_v43 = vand.u32 4294901760, %v483_v14  ;;  %v495_v16 = vsub.f32 %v1436_v27, %v2013_v61  ;;  %v490_v14 = vand.u32 4294901760, %v489_v15  ;;  %v1512_v36 = vand.u32 4294901760, %v56_v37 }
  0x2f   :  { %420 = vmatpush.msrb.mxu2 %v1352_v54  ;;  %479 = vmatpush.msrb.mxu3 %v478_v47  ;;  %v1515_v61 = vsub.f32 %v57_v2, %v1489_v19  ;;  %v1526_v15 = vsub.f32 %v36_v13, %v1502_v22 }
  0x30   :  { %328 = vmatpush.msrb.mxu0 %v2012_v18  ;;  %379 = vmatpush.msrb.mxu1 %v1192_v3  ;;  %v2014_v3 = vand.u32 4294901760, %v1224_v20  ;;  %v501_v18 = vsub.f32 %v1442_v35, %v2003_v0  ;;  %v2015_v20 = vand.u32 4294901760, %v1237_v29  ;;  %v55_v0 = vld [vmem:[#allocation2 + $0x88] sm:$0xff]  ;;  %v496_v47 = vand.u32 4294901760, %v495_v16 }
  0x31   :  { %422 = vmatpush.msrb.mxu2 %v1367_v12  ;;  %485 = vmatpush.msrb.mxu3 %v484_v43  ;;  %v2017_v29 = vand.u32 4294901760, %v1262_v40  ;;  %v2018_v43 = vand.u32 4294901760, %v1471_v59  ;;  %v1528_v2 = vand.u32 4294901760, %v55_v0  ;;  %v2019_v40 = vand.u32 4294901760, %v1273_v46 }
  0x32   :  { %332 = vmatpush.msrb.mxu0 %v2014_v3  ;;  %381 = vmatpush.msrb.mxu1 %v1194_v4  ;;  %v2016_v4 = vand.u32 4294901760, %v1454_v45  ;;  %v1539_v13 = vsub.f32 %v56_v37, %v1512_v36  ;;  %v2021_v46 = vand.u32 4294901760, %v1285_v52 }
  0x33   :  { %424 = vmatpush.msrb.mxu2 %v1380_v26  ;;  %491 = vmatpush.msrb.mxu3 %v490_v14  ;;  %v513_v16 = vsub.f32 %v1471_v59, %v2018_v43  ;;  %v1552_v37 = vsub.f32 %v55_v0, %v1528_v2  ;;  %v2023_v0 = vand.u32 4294901760, %v1309_v1 }
  0x34   :  { %336 = vmatpush.msrb.mxu0 %v2015_v20  ;;  %383 = vmatpush.msrb.mxu1 %v1196_v5  ;;  %v507_v3 = vsub.f32 %v1454_v45, %v2016_v4  ;;  %v502_v5 = vand.u32 4294901760, %v501_v18  ;;  %v54_v20 = vld [vmem:[#allocation2 + $0x80] sm:$0xff]  ;;  %v524_v4 = vand.u32 4294901760, %v1500_v60  ;;  %v2020_v18 = vand.u32 4294901760, %v1487_v41 }
  0x35   :  { %426 = vmatpush.msrb.mxu2 %v1393_v51  ;;  %497 = vmatpush.msrb.mxu3 %v496_v47  ;;  %v1541_v43 = vand.u32 4294901760, %v54_v20  ;;  %v108_v47 = vand.u32 4294901760, %v1526_v15 }
  0x36   :  { %340 = vmatpush.msrb.mxu0 %v2017_v29  ;;  %385 = vmatpush.msrb.mxu1 %v1198_v9  ;;  %v508_v9 = vand.u32 4294901760, %v507_v3  ;;  %v519_v14 = vsub.f32 %v1487_v41, %v2020_v18  ;;  %v530_v29 = vand.u32 4294901760, %v1515_v61  ;;  %v525_v3 = vsub.f32 %v1500_v60, %v524_v4 }
  0x37   :  { %428 = vmatpush.msrb.mxu2 %v1408_v28  ;;  %503 = vmatpush.msrb.mxu3 %v502_v5  ;;  %v536_v5 = vand.u32 4294901760, %v1539_v13  ;;  %v542_v18 = vand.u32 4294901760, %v1552_v37 }
  0x38   :  { %344 = vmatpush.msrb.mxu0 %v2019_v40  ;;  %387 = vmatpush.msrb.mxu1 %v1200_v10  ;;  %v514_v10 = vand.u32 4294901760, %v513_v16  ;;  %v2022_v40 = vand.u32 4294901760, %v1297_v58  ;;  %v531_v52 = vsub.f32 %v1515_v61, %v530_v29  ;;  %v1563_v16 = vsub.f32 %v54_v20, %v1541_v43 }
  0x39   :  { %430 = vmatpush.msrb.mxu2 %v1415_v6  ;;  %509 = vmatpush.msrb.mxu3 %v508_v9  ;;  %v526_v58 = vand.u32 4294901760, %v525_v3  ;;  %v109_v9 = vsub.f32 %v1526_v15, %v108_v47  ;;  %v2024_v20 = vand.u32 4294901760, %v1314_v7  ;;  %v537_v1 = vsub.f32 %v1539_v13, %v536_v5 }
  0x3a   :  { %348 = vmatpush.msrb.mxu0 %v2021_v46  ;;  %389 = vmatpush.msrb.mxu1 %v1202_v11  ;;  %v520_v11 = vand.u32 4294901760, %v519_v14  ;;  %v548_v14 = vand.u32 4294901760, %v1563_v16  ;;  %v543_v7 = vsub.f32 %v1552_v37, %v542_v18  ;;  %v2026_v3 = vand.u32 4294901760, %v1350_v49 }
  0x3b   :  { %432 = vmatpush.msrb.mxu2 %v1428_v23  ;;  %515 = vmatpush.msrb.mxu3 %v514_v10  ;;  %v2025_v10 = vand.u32 4294901760, %v1337_v39  ;;  %v538_v39 = vand.u32 4294901760, %v537_v1 }
  0x3c   :  { %352 = vmatpush.msrb.mxu0 %v2022_v40  ;;  %391 = vmatpush.msrb.mxu1 %v1215_v17  ;;  %v37_v17 = vld [vmem:[%s1979_s0 + $0x8] sm:$0xff] }
  0x3d   :  { %434 = vmatpush.msrb.mxu2 %v1449_v30  ;;  %521 = vmatpush.msrb.mxu3 %v520_v11  ;;  %v1582_v46 = vand.u32 4294901760, %v37_v17  ;;  %v2027_v11 = vand.u32 4294901760, %v1357_v55  ;;  %v2030_v55 = vld [vmem:[#allocation5_spill] sm:$0xff] }
  0x3e   :  { %356 = vmatpush.msrb.mxu0 %v2023_v0  ;;  %393 = vmatpush.msrb.mxu1 %v1231_v25  ;;  %v532_v25 = vand.u32 4294901760, %v531_v52 }
  0x3f   :  { %436 = vmatpush.msrb.mxu2 %v1461_v57  ;;  %527 = vmatpush.msrb.mxu3 %v526_v58  ;;  %v1599_v40 = vsub.f32 %v37_v17, %v1582_v46  ;;  %v767_v17 = vld [vmem:[%s1982_s3 + $0x50] sm:$0xff] }
  0x40   :  { %360 = vmatpush.msrb.mxu0 %v2024_v20  ;;  %395 = vmatpush.msrb.mxu1 %v1250_v33  ;;  %v110_v33 = vand.u32 4294901760, %v109_v9  ;;  %v1782_v58 = vand.u32 4294901760, %v767_v17  ;;  %v766_v9 = vld [vmem:[%s1982_s3 + $0x48] sm:$0xff] }
  0x41   :  { %438 = vmatpush.msrb.mxu2 %v1473_v32  ;;  %533 = vmatpush.msrb.mxu3 %v532_v25  ;;  %v449_v52 = vand.u32 4294901760, %v1599_v40  ;;  %v1790_v20 = vand.u32 4294901760, %v766_v9  ;;  %v765_v25 = vld [vmem:[%s1982_s3 + $0x40] sm:$0xff] }
  0x42   :  { %364 = vmatpush.msrb.mxu0 %v2025_v10  ;;  %397 = vmatpush.msrb.mxu1 %v1253_v34  ;;  %v549_v34 = vsub.f32 %v1563_v16, %v548_v14  ;;  %v764_v10 = vld [vmem:[%s1982_s3 + $0x38] sm:$0xff] }
  0x43   :  { %440 = vmatpush.msrb.mxu2 %v1489_v19  ;;  %111 = vmatmul.f32.vlgmr.msra.gmra.mxu0 %v110_v33 }
  0x44   :  { %368 = vmatpush.msrb.mxu0 %v2026_v3  ;;  %399 = vmatpush.msrb.mxu1 %v1269_v44  ;;  %v544_v44 = vand.u32 4294901760, %v543_v7  ;;  %v550_v49 = vand.u32 4294901760, %v549_v34  ;;  %v763_v34 = vld [vmem:[%s1982_s3 + $0x30] sm:$0xff] }
  0x45   :  { %442 = vmatpush.msrb.mxu2 %v1512_v36  ;;  %539 = vmatpush.msrb.mxu3 %v538_v39  ;;  %v1816_v39 = vand.u32 4294901760, %v764_v10 }
  0x46   :  { %372 = vmatpush.msrb.mxu0 %v2027_v11  ;;  %401 = vmatpush.msrb.mxu1 %v1281_v50  ;;  %v2028_v50 = vand.u32 4294901760, %v1343_v42 }
  0x47   :  { %444 = vmatpush.msrb.mxu2 %v1528_v2  ;;  %545 = vmatpush.msrb.mxu3 %v544_v44 }
  0x48   :  { %559 = vmatpush.msra.mxu0 %v1343_v42  ;;  %403 = vmatpush.msrb.mxu1 %v1289_v53  ;;  %v450_v53 = vsub.f32 %v1599_v40, %v449_v52 }
  0x49   :  { %446 = vmatpush.msrb.mxu2 %v1541_v43  ;;  %551 = vmatpush.msrb.mxu3 %v550_v49  ;;  %v1829_v49 = vsub.f32 %v764_v10, %v1816_v39 }
  0x4a   :  { %562 = vmatpush.msra.mxu0 %v1360_v56  ;;  %405 = vmatpush.msrb.mxu1 %v1305_v63  ;;  %v2029_v63 = vand.u32 4294901760, %v1360_v56  ;;  %v451_v42 = vand.u32 4294901760, %v450_v53  ;;  %v2032_v56 = vand.u32 4294901760, %v1391_v48 }
  0x4b   :  { %266 = vmatmul.f32.vlgmr.msra.gmra.mxu2 %v1526_v15  ;;  %305 = vmatmul.f32.vlgmr.msra.gmra.mxu3 %v108_v47 }
  0x4c   :  { %565 = vmatpush.msra.mxu0 %v1378_v38  ;;  %653 = vmatpush.msra.mxu2 %v2028_v50  ;;  %v762_v50 = vld [vmem:[%s1982_s3 + $0x28] sm:$0xff] }
  0x4d   :  { %407 = vmatpush.msrb.mxu1 %v1322_v21  ;;  %720 = vmatpush.msra.mxu3 %v1316_v8  ;;  %v2031_v21 = vand.u32 4294901760, %v1378_v38  ;;  %v2033_v38 = vand.u32 4294901760, %v1406_v62 }
  0x4e   :  { %568 = vmatpush.msra.mxu0 %v1391_v48  ;;  %657 = vmatpush.msra.mxu2 %v2029_v63  ;;  %v2038_v48 = vand.u32 4294901760, %v1471_v59 }
  0x4f   :  { %409 = vmatpush.msrb.mxu1 %v2030_v55  ;;  %722 = vmatpush.msra.mxu3 %v1329_v31  ;;  %v868_v55 = vand.u32 4294901760, %v1829_v49 }
  0x50   :  { %571 = vmatpush.msra.mxu0 %v1406_v62  ;;  %212 = vmatmul.f32.vlgmr.msra.gmra.mxu1 %v1502_v22  ;;  %v2037_v62 = vand.u32 4294901760, %v1454_v45 }
  0x51   :  { %661 = vmatpush.msra.mxu2 %v2031_v21  ;;  %612 = vmatpush.msra.mxu1 %v1316_v8  ;;  %v2034_v8 = vand.u32 4294901760, %v1423_v24  ;;  %v1843_v21 = vand.u32 4294901760, %v762_v50 }
  0x52   :  { %574 = vmatpush.msra.mxu0 %v1423_v24  ;;  %724 = vmatpush.msra.mxu3 %v1352_v54  ;;  %v2036_v24 = vand.u32 4294901760, %v1442_v35 }
  0x53   :  { %665 = vmatpush.msra.mxu2 %v2032_v56  ;;  %614 = vmatpush.msra.mxu1 %v1329_v31  ;;  %v2035_v31 = vand.u32 4294901760, %v1436_v27  ;;  %v761_v56 = vld [vmem:[%s1982_s3 + $0x20] sm:$0xff] }
  0x54   :  { %452 = vmatmul.f32.vlgmr.msrb.gmra.mxu2 %v451_v42  ;;  %577 = vmatpush.msra.mxu0 %v1436_v27  ;;  %v771_v27 = vld [vmem:[%s1982_s3 + $0x70] sm:$0xff] }
  0x55   :  { %616 = vmatpush.msra.mxu1 %v1352_v54  ;;  %669 = vmatpush.msra.mxu2 %v2033_v38  ;;  %v772_v54 = vld [vmem:[%s1982_s3 + $0x78] sm:$0xff] }
  0x56   :  { %726 = vmatpush.msra.mxu3 %v1367_v12  ;;  %374 = vmatmul.f32.vlgmr.msrb.gmra.mxu0 %v1502_v22 }
  0x57   :  { %553 = vmatmul.f32.vlgmr.msrb.gmra.mxu3 %v1582_v46  ;;  %580 = vmatpush.msra.mxu0 %v1442_v35 }
  0x58   :  { %618 = vmatpush.msra.mxu1 %v1367_v12  ;;  %673 = vmatpush.msra.mxu2 %v2034_v8  ;;  %v1676_v12 = vand.u32 4294901760, %v771_v27  ;;  %v869_v8 = vsub.f32 %v1829_v49, %v868_v55 }
  0x59   :  { %728 = vmatpush.msra.mxu3 %v1380_v26  ;;  %411 = vmatmul.f32.vlgmr.msrb.gmra.mxu1 %v1502_v22 }
  0x5a   :  { %583 = vmatpush.msra.mxu0 %v1454_v45  ;;  %620 = vmatpush.msra.mxu1 %v1380_v26  ;;  %v1666_v26 = vand.u32 4294901760, %v772_v54 }
  0x5b   :  { %677 = vmatpush.msra.mxu2 %v2035_v31  ;;  %730 = vmatpush.msra.mxu3 %v1393_v51  ;;  %v1858_v31 = vsub.f32 %v762_v50, %v1843_v21 }
  0x5c   :  { %586 = vmatpush.msra.mxu0 %v1471_v59  ;;  %622 = vmatpush.msra.mxu1 %v1393_v51  ;;  %v770_v51 = vld [vmem:[%s1982_s3 + $0x68] sm:$0xff]  ;;  %v1687_v35 = vsub.f32 %v772_v54, %v1666_v26  ;;  %v768_v59 = vld [vmem:[%s1982_s3 + $0x58] sm:$0xff]  ;;  %v1860_v54 = vand.u32 4294901760, %v761_v56 }
  0x5d   :  { %681 = vmatpush.msra.mxu2 %v2036_v24  ;;  %732 = vmatpush.msra.mxu3 %v1408_v28  ;;  %v1689_v45 = vand.u32 4294901760, %v770_v51 }
  0x5e   :  { %589 = vmatpush.msra.mxu0 %v1487_v41  ;;  %624 = vmatpush.msra.mxu1 %v1408_v28  ;;  %v769_v28 = vld [vmem:[%s1982_s3 + $0x60] sm:$0xff] }
  0x5f   :  { %685 = vmatpush.msra.mxu2 %v2037_v62  ;;  %734 = vmatpush.msra.mxu3 %v1415_v6  ;;  %v1702_v22 = vand.u32 4294901760, %v769_v28  ;;  %v1711_v15 = vsub.f32 %v770_v51, %v1689_v45  ;;  %v870_v62 = vand.u32 4294901760, %v869_v8  ;;  %v880_v51 = vand.u32 4294901760, %v1858_v31 }
  0x60   :  { %592 = vmatpush.msra.mxu0 %v1500_v60  ;;  %626 = vmatpush.msra.mxu1 %v1415_v6  ;;  %v2039_v6 = vand.u32 4294901760, %v1487_v41  ;;  %v820_v41 = vand.u32 4294901760, %v1687_v35 }
  0x61   :  { %689 = vmatpush.msra.mxu2 %v2038_v48  ;;  %736 = vmatpush.msra.mxu3 %v1428_v23  ;;  %v1870_v48 = vsub.f32 %v761_v56, %v1860_v54 }
  0x62   :  { %595 = vmatpush.msra.mxu0 %v1515_v61  ;;  %628 = vmatpush.msra.mxu1 %v1428_v23  ;;  %v1700_v23 = vsub.f32 %v771_v27, %v1676_v12  ;;  %v821_v61 = vsub.f32 %v1687_v35, %v820_v41  ;;  %v760_v27 = vld [vmem:[%s1982_s3 + $0x18] sm:$0xff] }
  0x63   :  { %693 = vmatpush.msra.mxu2 %v2039_v6  ;;  %738 = vmatpush.msra.mxu3 %v1449_v30 }
  0x64   :  { %598 = vmatpush.msra.mxu0 %v1539_v13  ;;  %630 = vmatpush.msra.mxu1 %v1449_v30  ;;  %v1713_v30 = vand.u32 4294901760, %v768_v59  ;;  %v826_v60 = vand.u32 4294901760, %v1700_v23  ;;  %v822_v13 = vand.u32 4294901760, %v821_v61  ;;  %v881_v61 = vsub.f32 %v1858_v31, %v880_v51 }
  0x65   :  { %697 = vmatpush.msra.mxu2 %v524_v4  ;;  %740 = vmatpush.msra.mxu3 %v1461_v57 }
  0x66   :  { %601 = vmatpush.msra.mxu0 %v1552_v37  ;;  %632 = vmatpush.msra.mxu1 %v1461_v57  ;;  %v1722_v57 = vsub.f32 %v769_v28, %v1702_v22  ;;  %v1734_v4 = vsub.f32 %v768_v59, %v1713_v30  ;;  %v1872_v28 = vand.u32 4294901760, %v760_v27  ;;  %v759_v59 = vld [vmem:[%s1982_s3 + $0x10] sm:$0xff] }
  0x67   :  { %701 = vmatpush.msra.mxu2 %v530_v29  ;;  %742 = vmatpush.msra.mxu3 %v1473_v32 }
  0x68   :  { %604 = vmatpush.msra.mxu0 %v1563_v16  ;;  %634 = vmatpush.msra.mxu1 %v1473_v32  ;;  %v832_v32 = vand.u32 4294901760, %v1711_v15  ;;  %v838_v29 = vand.u32 4294901760, %v1722_v57  ;;  %v844_v47 = vand.u32 4294901760, %v1734_v4 }
  0x69   :  { %705 = vmatpush.msra.mxu2 %v536_v5  ;;  %744 = vmatpush.msra.mxu3 %v1489_v19 }
  0x6a   :  { %607 = vmatmul.f32.vlgmr.msra.gmra.mxu0 %v1599_v40  ;;  %636 = vmatpush.msra.mxu1 %v1489_v19  ;;  %v827_v19 = vsub.f32 %v1700_v23, %v826_v60  ;;  %v845_v16 = vsub.f32 %v1734_v4, %v844_v47 }
  0x6b   :  { %709 = vmatpush.msra.mxu2 %v542_v18  ;;  %746 = vmatpush.msra.mxu3 %v1512_v36  ;;  %v1788_v18 = vsub.f32 %v767_v17, %v1782_v58 }
  0x6c   :  { %638 = vmatpush.msra.mxu1 %v1512_v36  ;;  %778 = vmatpush.msrb.mxu0 %v1666_v26  ;;  %v833_v36 = vsub.f32 %v1711_v15, %v832_v32  ;;  %v828_v37 = vand.u32 4294901760, %v827_v19  ;;  %v846_v0 = vand.u32 4294901760, %v845_v16  ;;  %v886_v19 = vand.u32 4294901760, %v1870_v48 }
  0x6d   :  { %713 = vmatpush.msra.mxu2 %v548_v14  ;;  %748 = vmatpush.msra.mxu3 %v1528_v2  ;;  %v850_v1 = vand.u32 4294901760, %v1788_v18  ;;  %v1799_v14 = vsub.f32 %v766_v9, %v1790_v20  ;;  %v757_v9 = vld [vmem:[%s1982_s3] sm:$0xff] }
  0x6e   :  { %715 = vmatmul.f32.vlgmr.msra.gmra.mxu2 %v1582_v46  ;;  %640 = vmatpush.msra.mxu1 %v1528_v2  ;;  %v839_v2 = vsub.f32 %v1722_v57, %v838_v29  ;;  %v834_v5 = vand.u32 4294901760, %v833_v36  ;;  %v1890_v36 = vand.u32 4294901760, %v759_v59  ;;  %v887_v16 = vsub.f32 %v1870_v48, %v886_v19 }
  0x6f   :  { %750 = vmatpush.msra.mxu3 %v1541_v43  ;;  %780 = vmatpush.msrb.mxu0 %v1676_v12  ;;  %v851_v33 = vsub.f32 %v1788_v18, %v850_v1  ;;  %v856_v7 = vand.u32 4294901760, %v1799_v14 }
  0x70   :  { %752 = vmatmul.f32.vlgmr.msra.gmra.mxu3 %v1582_v46  ;;  %642 = vmatpush.msra.mxu1 %v1541_v43  ;;  %v840_v43 = vand.u32 4294901760, %v839_v2  ;;  %v1801_v46 = vand.u32 4294901760, %v765_v25  ;;  %v758_v2 = vld [vmem:[%s1982_s3 + $0x8] sm:$0xff] }
  0x71   :  { %646 = vmatmul.f32.vlgmr.msra.gmra.mxu1 %v449_v52  ;;  %782 = vmatpush.msrb.mxu0 %v1689_v45  ;;  %v852_v40 = vand.u32 4294901760, %v851_v33  ;;  %v857_v11 = vsub.f32 %v1799_v14, %v856_v7  ;;  %v1833_v52 = vand.u32 4294901760, %v763_v34  ;;  %v1906_v17 = vand.u32 4294901760, %v758_v2 }
  0x72   :  { %823 = vmatpush.msrb.mxu1 %v822_v13  ;;  %921 = vmatpush.msrb.mxu2 %v1687_v35  ;;  %v1814_v3 = vsub.f32 %v765_v25, %v1801_v46  ;;  %v1888_v13 = vsub.f32 %v760_v27, %v1872_v28  ;;  %v888_v25 = vand.u32 4294901760, %v887_v16 }
  0x73   :  { %784 = vmatpush.msrb.mxu0 %v1702_v22  ;;  %974 = vmatpush.msrb.mxu3 %v1666_v26  ;;  %v858_v53 = vand.u32 4294901760, %v857_v11  ;;  %v1847_v42 = vsub.f32 %v763_v34, %v1833_v52  ;;  %v1916_v34 = vand.u32 4294901760, %v757_v9 }
  0x74   :  { %829 = vmatpush.msrb.mxu1 %v828_v37  ;;  %924 = vmatpush.msrb.mxu2 %v1700_v23  ;;  %v862_v44 = vand.u32 4294901760, %v1814_v3 }
  0x75   :  { %786 = vmatpush.msrb.mxu0 %v1713_v30  ;;  %976 = vmatpush.msrb.mxu3 %v1676_v12  ;;  %v874_v24 = vand.u32 4294901760, %v1847_v42 }
  0x76   :  { %835 = vmatpush.msrb.mxu1 %v834_v5  ;;  %927 = vmatpush.msrb.mxu2 %v1711_v15  ;;  %v863_v63 = vsub.f32 %v1814_v3, %v862_v44  ;;  %v882_v5 = vand.u32 4294901760, %v881_v61 }
  0x77   :  { %978 = vmatpush.msrb.mxu3 %v1689_v45  ;;  %788 = vmatpush.msrb.mxu0 %v1782_v58  ;;  %v875_v6 = vsub.f32 %v1847_v42, %v874_v24 }
  0x78   :  { %841 = vmatpush.msrb.mxu1 %v840_v43  ;;  %930 = vmatpush.msrb.mxu2 %v1722_v57  ;;  %v864_v38 = vand.u32 4294901760, %v863_v63  ;;  %v892_v43 = vand.u32 4294901760, %v1888_v13 }
  0x79   :  { %980 = vmatpush.msrb.mxu3 %v1702_v22  ;;  %790 = vmatpush.msrb.mxu0 %v1790_v20  ;;  %v876_v37 = vand.u32 4294901760, %v875_v6 }
  0x7a   :  { %847 = vmatpush.msrb.mxu1 %v846_v0  ;;  %933 = vmatpush.msrb.mxu2 %v1734_v4  ;;  %v1903_v0 = vsub.f32 %v759_v59, %v1890_v36  ;;  %v893_v10 = vsub.f32 %v1888_v13, %v892_v43 }
  0x7b   :  { %982 = vmatpush.msrb.mxu3 %v1713_v30  ;;  %792 = vmatpush.msrb.mxu0 %v1801_v46 }
  0x7c   :  { %936 = vmatpush.msrb.mxu2 %v1788_v18  ;;  %853 = vmatpush.msrb.mxu1 %v852_v40  ;;  %v898_v33 = vand.u32 4294901760, %v1903_v0  ;;  %v903_v40 = vsub.f32 %v758_v2, %v1906_v17  ;;  %v894_v11 = vand.u32 4294901760, %v893_v10 }
  0x7d   :  { %984 = vmatpush.msrb.mxu3 %v1782_v58  ;;  %794 = vmatpush.msrb.mxu0 %v1816_v39 }
  0x7e   :  { %939 = vmatpush.msrb.mxu2 %v1799_v14  ;;  %859 = vmatpush.msrb.mxu1 %v858_v53  ;;  %v899_v50 = vsub.f32 %v1903_v0, %v898_v33  ;;  %v909_v53 = vsub.f32 %v757_v9, %v1916_v34  ;;  %v904_v63 = vand.u32 4294901760, %v903_v40 }
  0x7f   :  { %986 = vmatpush.msrb.mxu3 %v1790_v20  ;;  %796 = vmatpush.msrb.mxu0 %v1833_v52 }
  0x80   :  { %942 = vmatpush.msrb.mxu2 %v1814_v3  ;;  %865 = vmatpush.msrb.mxu1 %v864_v38  ;;  %v900_v56 = vand.u32 4294901760, %v899_v50  ;;  %v910_v38 = vand.u32 4294901760, %v909_v53  ;;  %v905_v8 = vsub.f32 %v903_v40, %v904_v63 }
  0x81   :  { %988 = vmatpush.msrb.mxu3 %v1801_v46  ;;  %798 = vmatpush.msrb.mxu0 %v1843_v21 }
  0x82   :  { %945 = vmatpush.msrb.mxu2 %v1829_v49  ;;  %871 = vmatpush.msrb.mxu1 %v870_v62  ;;  %v911_v27 = vsub.f32 %v909_v53, %v910_v38  ;;  %v906_v62 = vand.u32 4294901760, %v905_v8 }
  0x83   :  { %990 = vmatpush.msrb.mxu3 %v1816_v39  ;;  %800 = vmatpush.msrb.mxu0 %v1860_v54 }
  0x84   :  { %948 = vmatpush.msrb.mxu2 %v1847_v42  ;;  %877 = vmatpush.msrb.mxu1 %v876_v37  ;;  %v912_v6 = vand.u32 4294901760, %v911_v27 }
  0x85   :  { %992 = vmatpush.msrb.mxu3 %v1833_v52  ;;  %802 = vmatpush.msrb.mxu0 %v1872_v28 }
  0x86   :  { %951 = vmatpush.msrb.mxu2 %v1858_v31  ;;  %883 = vmatpush.msrb.mxu1 %v882_v5 }
  0x87   :  { %994 = vmatpush.msrb.mxu3 %v1843_v21  ;;  %804 = vmatpush.msrb.mxu0 %v1890_v36 }
  0x88   :  { %954 = vmatpush.msrb.mxu2 %v1870_v48  ;;  %889 = vmatpush.msrb.mxu1 %v888_v25 }
  0x89   :  { %996 = vmatpush.msrb.mxu3 %v1860_v54  ;;  %806 = vmatpush.msrb.mxu0 %v1906_v17 }
  0x8a   :  { %957 = vmatpush.msrb.mxu2 %v1888_v13  ;;  %895 = vmatpush.msrb.mxu1 %v894_v11 }
  0x8b   :  { %998 = vmatpush.msrb.mxu3 %v1872_v28  ;;  %808 = vmatpush.msrb.mxu0 %v1916_v34 }
  0x8c   :  { %960 = vmatpush.msrb.mxu2 %v1903_v0  ;;  %901 = vmatpush.msrb.mxu1 %v900_v56 }
  0x8d   :  { %1000 = vmatpush.msrb.mxu3 %v1890_v36  ;;  %1015 = vmatpush.msra.mxu0 %v820_v41 }
  0x8e   :  { %963 = vmatpush.msrb.mxu2 %v903_v40  ;;  %907 = vmatpush.msrb.mxu1 %v906_v62 }
  0x8f   :  { %1002 = vmatpush.msrb.mxu3 %v1906_v17  ;;  %1019 = vmatpush.msra.mxu0 %v826_v60 }
  0x90   :  { %966 = vmatpush.msrb.mxu2 %v909_v53  ;;  %913 = vmatpush.msrb.mxu1 %v912_v6 }
  0x91   :  { %1004 = vmatpush.msrb.mxu3 %v1916_v34  ;;  %1023 = vmatpush.msra.mxu0 %v832_v32 }
  0x92   :  { %1082 = vmatpush.msra.mxu1 %v1666_v26  ;;  %v1128_v26 = vld [vmem:[%s1981_s2] ss:$0 sm:$0xff] }
  0x93   :  { %1027 = vmatpush.msra.mxu0 %v838_v29 }
  0x94   :  { %1084 = vmatpush.msra.mxu1 %v1676_v12 }
  0x95   :  { %1031 = vmatpush.msra.mxu0 %v844_v47 }
  0x96   :  { %1086 = vmatpush.msra.mxu1 %v1689_v45 }
  0x97   :  { %1035 = vmatpush.msra.mxu0 %v850_v1 }
  0x98   :  { %1088 = vmatpush.msra.mxu1 %v1702_v22 }
  0x99   :  { %1039 = vmatpush.msra.mxu0 %v856_v7 }
  0x9a   :  { %1090 = vmatpush.msra.mxu1 %v1713_v30 }
  0x9b   :  { %1043 = vmatpush.msra.mxu0 %v862_v44 }
  0x9c   :  { %1092 = vmatpush.msra.mxu1 %v1782_v58 }
  0x9d   :  { %1047 = vmatpush.msra.mxu0 %v868_v55 }
  0x9e   :  { %1094 = vmatpush.msra.mxu1 %v1790_v20 }
  0x9f   :  { %1051 = vmatpush.msra.mxu0 %v874_v24 }
  0xa0   :  { %1096 = vmatpush.msra.mxu1 %v1801_v46 }
  0xa1   :  { %1055 = vmatpush.msra.mxu0 %v880_v51 }
  0xa2   :  { %1098 = vmatpush.msra.mxu1 %v1816_v39 }
  0xa3   :  { %1059 = vmatpush.msra.mxu0 %v886_v19 }
  0xa4   :  { %1100 = vmatpush.msra.mxu1 %v1833_v52 }
  0xa5   :  { %1063 = vmatpush.msra.mxu0 %v892_v43 }
  0xa6   :  { %1102 = vmatpush.msra.mxu1 %v1843_v21 }
  0xa7   :  { %1067 = vmatpush.msra.mxu0 %v898_v33 }
  0xa8   :  { %1104 = vmatpush.msra.mxu1 %v1860_v54  ;;  %v1129_v54 = vld [vmem:[%s1983_s4] ss:$0 sm:$0xff] }
  0xa9   :  { %1071 = vmatpush.msra.mxu0 %v904_v63 }
  0xaa   :  { %1106 = vmatpush.msra.mxu1 %v1872_v28 }
  0xab   :  { %1075 = vmatpush.msra.mxu0 %v910_v38 }
  0xac   :  { %1108 = vmatpush.msra.mxu1 %v1890_v36 }
  0xae   :  { %1110 = vmatpush.msra.mxu1 %v1906_v17 }
  0xb0   :  { %1112 = vmatpush.msra.mxu1 %v1916_v34 }
  0xc0   :  { %v112_v35 = vpop.f32.mrf.mxu0 }
  0xc1   :  { %v113_v12 = vadd.f32 %v1128_v26, %v112_v35 }
  0xcd   :  { %v213_v45 = vpop.f32.mrf.mxu1 }
  0xce   :  { %v214_v23 = vadd.f32 %v213_v45, %v113_v12  ;;  %v267_v22 = vpop.f32.mrf.mxu2  ;;  %v306_v15 = vpop.f32.mrf.mxu3 }
  0xd0   :  { %v268_v41 = vadd.f32 %v267_v22, %v214_v23 }
  0xd2   :  { %v307_v30 = vadd.f32 %v306_v15, %v268_v41 }
  0xd3   :  { %v375_v60 = vpop.f32.mrf.mxu0 }
  0xd4   :  { %v376_v57 = vadd.f32 %v375_v60, %v307_v30 }
  0xd6   :  { %v412_v32 = vpop.f32.mrf.mxu1 }
  0xd7   :  { %v413_v4 = vadd.f32 %v412_v32, %v376_v57  ;;  %v453_v29 = vpop.f32.mrf.mxu2 }
  0xd9   :  { %v454_v47 = vadd.f32 %v453_v29, %v413_v4 }
  0xda   :  { %v554_v58 = vpop.f32.mrf.mxu3 }
  0xdb   :  { %v555_v20 = vadd.f32 %v554_v58, %v454_v47 }
  0xe7   :  { %v608_v18 = vpop.f32.mrf.mxu0 }
  0xe8   :  { %v609_v1 = vadd.f32 %v608_v18, %v555_v20 }
  0xee   :  { %v647_v14 = vpop.f32.mrf.mxu1 }
  0xef   :  { %v648_v46 = vadd.f32 %v647_v14, %v609_v1 }
  0xf1   :  { %v716_v7 = vpop.f32.mrf.mxu2 }
  0xf2   :  { %v717_v3 = vadd.f32 %v716_v7, %v648_v46 }
  0xf3   :  { %v753_v39 = vpop.f32.mrf.mxu3 }
  0xf4   :  { %v754_v44 = vadd.f32 %v753_v39, %v717_v3 }
  0xf6   :  { %v756_v49 = vmax.f32 %v754_v44, 0.0 }
  0xf8   :  { %v809_v52 = vand.u32 4294901760, %v756_v49 }
  0xfa   :  { %v810_v55 = vsub.f32 %v756_v49, %v809_v52  ;;  %915 = vmatmul.f32.vlgmr.msrb.gmra.mxu1 %v809_v52 }
  0xfc   :  { %v811_v21 = vand.u32 4294901760, %v810_v55  ;;  %969 = vmatmul.f32.vlgmr.msrb.gmra.mxu2 %v810_v55 }
  0xfe   :  { %v812_v42 = vsub.f32 %v810_v55, %v811_v21  ;;  %1008 = vmatmul.f32.vlgmr.msrb.gmra.mxu3 %v811_v21 }
 0x100   :  { %v813_v31 = vand.u32 4294901760, %v812_v42 }
 0x102   :  { %814 = vmatmul.f32.vlgmr.msrb.gmra.mxu0 %v813_v31  ;;  %1114 = vmatmul.f32.vlgmr.msra.gmra.mxu1 %v809_v52 }
 0x10a   :  { %1077 = vmatmul.f32.vlgmr.msra.gmra.mxu0 %v809_v52 }
 0x177   :  { %v916_v24 = vpop.f32.mrf.mxu1 }
 0x17f   :  { %v815_v51 = vpop.f32.mrf.mxu0  ;;  %v970_v59 = vpop.f32.mrf.mxu2 }
 0x180   :  { %v816_v48 = vadd.f32 %v1129_v54, %v815_v51  ;;  %v1115_v2 = vpop.f32.mrf.mxu1 }
 0x181   :  { %v1009_v19 = vpop.f32.mrf.mxu3 }
 0x182   :  { %v917_v28 = vadd.f32 %v916_v24, %v816_v48 }
 0x184   :  { %v971_v61 = vadd.f32 %v970_v59, %v917_v28 }
 0x186   :  { %v1010_v13 = vadd.f32 %v1009_v19, %v971_v61 }
 0x187   :  { %v1078_v36 = vpop.f32.mrf.mxu0 }
 0x188   :  { %v1079_v37 = vadd.f32 %v1078_v36, %v1010_v13 }
 0x18a   :  { %v1116_v5 = vadd.f32 %v1115_v2, %v1079_v37 }
 0x18c   :  { %v1118_v16 = vmax.f32 %v1116_v5, 0.0 }
 0x18e   :  { %1119 = vst [vmem:[%s1984_s5] sm:$0xff] %v1118_v16 }
 0x18f   :  { %1124 = vsyncpa [#allocation3], 1 }

</bundles_post_ra>
